<compile_context>
chip_gen: v7x
topology: tpu7x:2x2x1
jax: 0.10.0
libtpu: 0.0.40
codegen_flags: <defaults>
</compile_context>

<pallas_src>
import jax
import jax.numpy as jnp
from jax.experimental import pallas as pl
from jax.experimental.pallas import tpu as pltpu


def _round_up(x: int, m: int) -> int:
    return ((x + m - 1) // m) * m


def _ceil_div(a: int, b: int) -> int:
    return -(-a // b)


def critic_kernel(x_ref, w1_ref, b1_ref, w2_ref, b2_ref, w3_ref, b3_ref, o_ref):
    """One batch tile: x (bb, obs) -> q (bb, 1) f32."""
    x = x_ref[...]
    # Layer 1: MXU matmul (weight dtype operands, f32 accumulate); f32 epilogue.
    h1 = jnp.dot(x.astype(w1_ref.dtype), w1_ref[...],
                 preferred_element_type=jnp.float32)
    h1 = jnp.maximum(h1 + b1_ref[...], 0.0)
    # Layer 2: same.
    h2 = jnp.dot(h1.astype(w2_ref.dtype), w2_ref[...],
                 preferred_element_type=jnp.float32)
    h2 = jnp.maximum(h2 + b2_ref[...], 0.0)
    # Layer 3 (output width 1): off the MXU — VPU multiply, then fold the lane
    # dimension down to <=128 with vreg-aligned VALU adds before the XLU
    # lane-reduce (keeps the vector-extended slots free for the vmatmul pushes).
    v = h2 * w3_ref[...]
    w = v.shape[-1]
    while w > 128 and w % 2 == 0 and (w // 2) % 128 == 0:
        half = w // 2
        v = v[:, :half] + v[:, half:]
        w = half
    q = jnp.sum(v, axis=-1, keepdims=True) + b3_ref[...]
    o_ref[...] = q.astype(o_ref.dtype)


def critic_forward(state, params, *, block_b=None, weight_dtype=jnp.bfloat16):
    """state: (B, obs) f32 or bf16. params: w1 (obs,h1), b1 (1,h1), w2 (h1,h2),
    b2 (1,h2), w3 (h2,1), b3 (1,1). Returns (B, 1) float32."""
    B, obs = state.shape
    w1 = params["w1"].astype(weight_dtype)
    b1 = params["b1"].reshape(1, -1).astype(jnp.float32)
    w2 = params["w2"].astype(weight_dtype)
    b2 = params["b2"].reshape(1, -1).astype(jnp.float32)
    w3 = params["w3"].reshape(1, -1).astype(jnp.float32)  # (1, h2), f32 (VPU path)
    b3 = params["b3"].reshape(1, 1).astype(jnp.float32)
    h1 = w1.shape[1]
    h2 = w2.shape[1]

    # ---- Batch tile heuristic -----------------------------------------------
    # Per-grid-step overhead is ~0.35us; with h~256 a 512-row tile is only
    # ~0.5-1us of MXU work, so small batches run as a single step.  Large
    # batches use ~1024-row tiles (cap 2048) with an EVEN step count so v7x can
    # balance the "parallel" batch axis across its two TensorCores.
    MAX_TILE = 2048
    if block_b is None:
        if B <= 512:
            block_b = _round_up(B, 8)
        else:
            n_steps = max(2, _ceil_div(B, 1024))
            if n_steps % 2:
                n_steps += 1
            block_b = min(MAX_TILE, _round_up(_ceil_div(B, n_steps), 8))
    block_b = max(8, _round_up(int(block_b), 8))

    # ---- Ragged-batch handling: pad to a multiple of block_b ----------------
    # Padded rows produce nonzero critic values (ReLU(b) propagates); they are
    # sliced off below and must never be reduced over before slicing.
    B_pad = _round_up(B, block_b)
    x = state  # keep native dtype: no f32 round-trip on the dominant DMA stream
    if B_pad != B:
        x = jnp.pad(x, ((0, B_pad - B), (0, 0)))
    grid = (B_pad // block_b,)

    # ---- Advisory cost estimate ---------------------------------------------
    w_bytes = (w1.size * w1.dtype.itemsize + w2.size * w2.dtype.itemsize
               + (w3.size + b1.size + b2.size + b3.size) * 4)
    cost = pl.CostEstimate(
        flops=2 * B_pad * (obs * h1 + h1 * h2 + h2),
        transcendentals=0,
        bytes_accessed=B_pad * obs * x.dtype.itemsize + B_pad * 4 + int(w_bytes),
    )

    out = pl.pallas_call(
        critic_kernel,
        out_shape=jax.ShapeDtypeStruct((B_pad, 1), jnp.float32),
        grid_spec=pltpu.PrefetchScalarGridSpec(
            num_scalar_prefetch=0,
            grid=grid,
            in_specs=[
                # State tile: pipelined (double-buffered) along the batch grid.
                pl.BlockSpec((block_b, obs), lambda i: (i, 0)),
                # Weights / biases: whole-array blocks, constant index_map ->
                # fetched once, resident in VMEM across all grid steps.
                pl.BlockSpec((obs, h1), lambda i: (0, 0)),   # W1 (bf16)
                pl.BlockSpec((1, h1), lambda i: (0, 0)),     # b1 (f32)
                pl.BlockSpec((h1, h2), lambda i: (0, 0)),    # W2 (bf16)
                pl.BlockSpec((1, h2), lambda i: (0, 0)),     # b2 (f32)
                pl.BlockSpec((1, h2), lambda i: (0, 0)),     # W3 row (f32)
                pl.BlockSpec((1, 1), lambda i: (0, 0)),      # b3 (f32)
            ],
            out_specs=pl.BlockSpec((block_b, 1), lambda i: (i, 0)),
        ),
        compiler_params=pltpu.CompilerParams(
            dimension_semantics=("parallel",),
            # Raises v5e's 16 MiB default scoped VMEM; matches v6e/v7x default
            # and is well under physical VMEM on every generation.
            vmem_limit_bytes=32 * 1024 * 1024,
        ),
        cost_estimate=cost,
    )(x, w1, b1, w2, b2, w3, b3)

    return out[:B] if B_pad != B else out


def init_critic_params(key, observation_size, hidden_size=(32, 32)):
    """Deterministic synthetic init (uniform fan-in scaling, like nn.Linear)."""
    h1, h2 = hidden_size
    ks = jax.random.split(key, 6)

    def lin(kw, kb, fan_in, fan_out):
        bound = 1.0 / jnp.sqrt(fan_in)
        w = jax.random.uniform(kw, (fan_in, fan_out), jnp.float32, -bound, bound)
        b = jax.random.uniform(kb, (1, fan_out), jnp.float32, -bound, bound)
        return w, b

    w1, b1 = lin(ks[0], ks[1], observation_size, h1)
    w2, b2 = lin(ks[2], ks[3], h1, h2)
    w3, b3 = lin(ks[4], ks[5], h2, 1)
    return {"w1": w1, "b1": b1, "w2": w2, "b2": b2, "w3": w3, "b3": b3}


def critic_reference(state, p, weight_dtype=jnp.float32):
    """Pure-JAX reference. With weight_dtype=bf16 it mirrors the kernel's
    mixed-precision path (bf16 operands, f32 accumulation)."""
    x = state.astype(jnp.float32)
    w1 = p["w1"].astype(weight_dtype)
    w2 = p["w2"].astype(weight_dtype)
    h1 = jnp.dot(x.astype(weight_dtype), w1, preferred_element_type=jnp.float32)
    h1 = jnp.maximum(h1 + p["b1"], 0.0)
    h2 = jnp.dot(h1.astype(weight_dtype), w2, preferred_element_type=jnp.float32)
    h2 = jnp.maximum(h2 + p["b2"], 0.0)
    return jnp.dot(h2, p["w3"], preferred_element_type=jnp.float32) + p["b3"]


if __name__ == "__main__":
    key = jax.random.PRNGKey(0)
    k_params, k_state1, k_state2 = jax.random.split(key, 3)

    observation_size = 16
    hidden_size = (32, 32)  # small stand-in for the default [256, 256]
    params = init_critic_params(k_params, observation_size, hidden_size)

    # Case 1: B=32 -> single-step grid with the new heuristic (block_b=32).
    state1 = jax.random.normal(k_state1, (32, observation_size), jnp.float32)
    out1 = jax.block_until_ready(critic_forward(state1, params))
    ref1 = critic_reference(state1, params, weight_dtype=jnp.bfloat16)
    ref1_f32 = critic_reference(state1, params, weight_dtype=jnp.float32)
    assert out1.shape == (32, 1)
    assert jnp.allclose(out1, ref1, atol=5e-3, rtol=5e-3)
    assert jnp.allclose(out1, ref1_f32, atol=1e-1, rtol=1e-1)

    # Case 1b: force block_b=16 -> multi-step grid, exercises the pipelined
    # path with weights resident across grid steps.
    out1b = jax.block_until_ready(critic_forward(state1, params, block_b=16))
    assert out1b.shape == (32, 1)
    assert jnp.allclose(out1b, ref1, atol=5e-3, rtol=5e-3)

    # Case 2: ragged batch -> exercises the zero-pad + slice-back path.
    state2 = jax.random.normal(k_state2, (10, observation_size), jnp.float32)
    out2 = jax.block_until_ready(critic_forward(state2, params))
    ref2 = critic_reference(state2, params, weight_dtype=jnp.bfloat16)
    assert out2.shape == (10, 1)
    assert jnp.allclose(out2, ref2, atol=5e-3, rtol=5e-3)

    print("KERNEL_OK")
</pallas_src>

<mosaic_0001>
module attributes {stable_mosaic.version = 11 : i64} {
  func.func @critic_kernel(%arg0: i32, %arg1: memref<32x16xf32, #tpu.memory_space<vmem>>, %arg2: memref<16x32xbf16, #tpu.memory_space<vmem>>, %arg3: memref<1x32xf32, #tpu.memory_space<vmem>>, %arg4: memref<32x32xbf16, #tpu.memory_space<vmem>>, %arg5: memref<1x32xf32, #tpu.memory_space<vmem>>, %arg6: memref<1x32xf32, #tpu.memory_space<vmem>>, %arg7: memref<1x1xf32, #tpu.memory_space<vmem>>, %arg8: memref<32x1xf32, #tpu.memory_space<vmem>>) attributes {dimension_semantics = [#tpu.dimension_semantics<parallel>], iteration_bounds = array<i64: 1>, scalar_prefetch = 0 : i64, scratch_operands = 0 : i64, tpu.core_type = #tpu.core_type<tc>, window_params = [{transform_indices = @transform_0, window_bounds = array<i64: 32, 16>}, {pipeline_mode = #tpu.pipeline_mode<synchronous>, transform_indices = @transform_1, window_bounds = array<i64: 16, 32>}, {pipeline_mode = #tpu.pipeline_mode<synchronous>, transform_indices = @transform_2, window_bounds = array<i64: 1, 32>}, {pipeline_mode = #tpu.pipeline_mode<synchronous>, transform_indices = @transform_3, window_bounds = array<i64: 32, 32>}, {pipeline_mode = #tpu.pipeline_mode<synchronous>, transform_indices = @transform_4, window_bounds = array<i64: 1, 32>}, {pipeline_mode = #tpu.pipeline_mode<synchronous>, transform_indices = @transform_5, window_bounds = array<i64: 1, 32>}, {pipeline_mode = #tpu.pipeline_mode<synchronous>, transform_indices = @transform_6, window_bounds = array<i64: 1, 1>}, {transform_indices = @transform_7, window_bounds = array<i64: 32, 1>}]} {
    %c0 = arith.constant 0 : index
    %c0_0 = arith.constant 0 : index
    %0 = vector.load %arg1[%c0, %c0_0] : memref<32x16xf32, #tpu.memory_space<vmem>>, vector<32x16xf32>
    %1 = arith.truncf %0 : vector<32x16xf32> to vector<32x16xbf16>
    %c0_1 = arith.constant 0 : index
    %c0_2 = arith.constant 0 : index
    %2 = vector.load %arg2[%c0_1, %c0_2] : memref<16x32xbf16, #tpu.memory_space<vmem>>, vector<16x32xbf16>
    %cst = arith.constant dense<0.000000e+00> : vector<32x32xf32>
    %3 = tpu.matmul %1, %2, %cst {dimension_numbers = #tpu.dot_dimension_numbers<[1], [0], [0], [1], [0, 0, 1, 1], [], []>} : vector<32x16xbf16>, vector<16x32xbf16>, vector<32x32xf32> -> vector<32x32xf32>
    %c0_3 = arith.constant 0 : index
    %c0_4 = arith.constant 0 : index
    %4 = vector.load %arg3[%c0_3, %c0_4] : memref<1x32xf32, #tpu.memory_space<vmem>>, vector<1x32xf32>
    %5 = vector.broadcast %4 : vector<1x32xf32> to vector<32x32xf32>
    %6 = arith.addf %3, %5 : vector<32x32xf32>
    %cst_5 = arith.constant 0.000000e+00 : f32
    %7 = vector.broadcast %cst_5 : f32 to vector<32x32xf32>
    %8 = arith.maximumf %6, %7 : vector<32x32xf32>
    %9 = arith.truncf %8 : vector<32x32xf32> to vector<32x32xbf16>
    %c0_6 = arith.constant 0 : index
    %c0_7 = arith.constant 0 : index
    %10 = vector.load %arg4[%c0_6, %c0_7] : memref<32x32xbf16, #tpu.memory_space<vmem>>, vector<32x32xbf16>
    %cst_8 = arith.constant dense<0.000000e+00> : vector<32x32xf32>
    %11 = tpu.matmul %9, %10, %cst_8 {dimension_numbers = #tpu.dot_dimension_numbers<[1], [0], [0], [1], [0, 0, 1, 1], [], []>} : vector<32x32xbf16>, vector<32x32xbf16>, vector<32x32xf32> -> vector<32x32xf32>
    %c0_9 = arith.constant 0 : index
    %c0_10 = arith.constant 0 : index
    %12 = vector.load %arg5[%c0_9, %c0_10] : memref<1x32xf32, #tpu.memory_space<vmem>>, vector<1x32xf32>
    %13 = vector.broadcast %12 : vector<1x32xf32> to vector<32x32xf32>
    %14 = arith.addf %11, %13 : vector<32x32xf32>
    %cst_11 = arith.constant 0.000000e+00 : f32
    %15 = vector.broadcast %cst_11 : f32 to vector<32x32xf32>
    %16 = arith.maximumf %14, %15 : vector<32x32xf32>
    %c0_12 = arith.constant 0 : index
    %c0_13 = arith.constant 0 : index
    %17 = vector.load %arg6[%c0_12, %c0_13] : memref<1x32xf32, #tpu.memory_space<vmem>>, vector<1x32xf32>
    %18 = vector.broadcast %17 : vector<1x32xf32> to vector<32x32xf32>
    %19 = arith.mulf %16, %18 : vector<32x32xf32>
    %cst_14 = arith.constant dense<0.000000e+00> : vector<32xf32>
    %20 = vector.multi_reduction <add>, %19, %cst_14 [1] : vector<32x32xf32> to vector<32xf32>
    %21 = vector.shape_cast %20 : vector<32xf32> to vector<32x1xf32>
    %c0_15 = arith.constant 0 : index
    %c0_16 = arith.constant 0 : index
    %22 = vector.load %arg7[%c0_15, %c0_16] : memref<1x1xf32, #tpu.memory_space<vmem>>, vector<1x1xf32>
    %23 = vector.broadcast %22 : vector<1x1xf32> to vector<32x1xf32>
    %24 = arith.addf %21, %23 : vector<32x1xf32>
    %c0_17 = arith.constant 0 : index
    %c0_18 = arith.constant 0 : index
    %25 = vector.load %arg8[%c0_17, %c0_18] : memref<32x1xf32, #tpu.memory_space<vmem>>, vector<32x1xf32>
    tpu.vector_store %arg8[%c0_17, %c0_18], %24 {strides = array<i32>} : memref<32x1xf32, #tpu.memory_space<vmem>>, vector<32x1xf32>,
    return
  }
  func.func @transform_0(%arg0: i32) -> (i32, i32) {
    %c0_i32 = arith.constant 0 : i32
    %c0_i32_0 = arith.constant 0 : i32
    return %arg0, %c0_i32 : i32, i32
  }
  func.func @transform_1(%arg0: i32) -> (i32, i32) {
    %c0_i32 = arith.constant 0 : i32
    %c0_i32_0 = arith.constant 0 : i32
    %c0_i32_1 = arith.constant 0 : i32
    return %c0_i32, %c0_i32_0 : i32, i32
  }
  func.func @transform_2(%arg0: i32) -> (i32, i32) {
    %c0_i32 = arith.constant 0 : i32
    %c0_i32_0 = arith.constant 0 : i32
    %c0_i32_1 = arith.constant 0 : i32
    return %c0_i32, %c0_i32_0 : i32, i32
  }
  func.func @transform_3(%arg0: i32) -> (i32, i32) {
    %c0_i32 = arith.constant 0 : i32
    %c0_i32_0 = arith.constant 0 : i32
    %c0_i32_1 = arith.constant 0 : i32
    return %c0_i32, %c0_i32_0 : i32, i32
  }
  func.func @transform_4(%arg0: i32) -> (i32, i32) {
    %c0_i32 = arith.constant 0 : i32
    %c0_i32_0 = arith.constant 0 : i32
    %c0_i32_1 = arith.constant 0 : i32
    return %c0_i32, %c0_i32_0 : i32, i32
  }
  func.func @transform_5(%arg0: i32) -> (i32, i32) {
    %c0_i32 = arith.constant 0 : i32
    %c0_i32_0 = arith.constant 0 : i32
    %c0_i32_1 = arith.constant 0 : i32
    return %c0_i32, %c0_i32_0 : i32, i32
  }
  func.func @transform_6(%arg0: i32) -> (i32, i32) {
    %c0_i32 = arith.constant 0 : i32
    %c0_i32_0 = arith.constant 0 : i32
    %c0_i32_1 = arith.constant 0 : i32
    return %c0_i32, %c0_i32_0 : i32, i32
  }
  func.func @transform_7(%arg0: i32) -> (i32, i32) {
    %c0_i32 = arith.constant 0 : i32
    %c0_i32_0 = arith.constant 0 : i32
    return %arg0, %c0_i32 : i32, i32
  }
}

</mosaic_0001>

<bundles_post_ra>
// kernel: tpu_custom_call.1
= control target key start
LH: loop header
LB: loop body
LE: loop exit
PB: predicated region body
PF: predicated region fallthrough
CT: control target
= control target key end

     0   :  { %vm50_vm0 = vcmask 130048   ;;  %vm135_vm1 = vcmask 261120   ;;  %vm229_vm2 = vcmask 7168   ;;  %s364_s1 = inlined_call_operand.vmem [shape: bf16[16,32], index: 1, kind: input, shape index: {}]   ;;  %s365_s0 = inlined_call_operand.vmem [shape: f32[32,16], index: 0, kind: input, shape index: {}]   ;;  %s366_s3 = inlined_call_operand.vmem [shape: bf16[32,32], index: 3, kind: input, shape index: {}]   ;;  %s367_s2 = inlined_call_operand.vmem [shape: f32[1,32], index: 2, kind: input, shape index: {}]   ;;  %s368_s6 = inlined_call_operand.<no memory space> [shape: f32[1,1], index: 6, kind: input, shape index: {}]   ;;  %s369_s4 = inlined_call_operand.vmem [shape: f32[1,32], index: 4, kind: input, shape index: {}]   ;;  %s370_s5 = inlined_call_operand.vmem [shape: f32[1,32], index: 5, kind: input, shape index: {}]   ;;  %s371_s7 = inlined_call_operand.vmem [shape: f32[32,1], index: 7, kind: output, shape index: {}]  }
   0x1   :  { %v270_v0 = vld [vmem:[%s364_s1] sm:$0xff]   ;;  %v30_v2 = vld [vmem:[%s365_s0 + $0x8] sm:$0xff]  ;;  %v31_v3 = vld [vmem:[%s365_s0 + $0x10] sm:$0xff]  ;;  %v12_v24 = vstv %s368_s6 }
   0x2   :  { %v29_v1 = vld [vmem:[%s365_s0] sm:$0xff]  ;;  %256 = vmatprep.subr.bf16.mxu0 %v270_v0  ;;  %v32_v5 = vld [vmem:[%s365_s0 + $0x18] sm:$0xff]  ;;  %v272_v8 = vld [vmem:[%s366_s3 + $0x8] sm:$0xff]   ;;  %13 = vst [vmem:[#allocation2] sm:$0x1] %v12_v24 }
   0x3   :  { %v33_v4 = vpack.c.bf16 %v30_v2, %v29_v1  ;;  %257 = vmatpush3.bf16.msra.mxu0 %v270_v0  ;;  %v34_v6 = vpack.c.bf16 %v32_v5, %v31_v3  ;;  %v271_v7 = vld [vmem:[%s366_s3] sm:$0xff]  }
   0x4   :  { %262 = vmatprep.subr.bf16.mxu1 %v271_v7  ;;  %v238_v9 = vld [vmem:[%s367_s2] ss:$0 sm:$0xff] }
   0x5   :  { %258 = vmatprep.mubr.msk.bf16.mxu0 %vm50_vm0, %v33_v4  ;;  %263 = vmatpush3.bf16.msra.mxu1 %v271_v7  ;;  %v242_v25 = vld [vmem:[%s369_s4] ss:$0 sm:$0xff] }
   0x6   :  { %259 = vmatmul.mubr.msk.bf16.vlgmr.msra.gmra.mrb[0].mxu0 %vm50_vm0, %v34_v6  ;;  %264 = vmatprep.subr.bf16.mxu1 %v272_v8  ;;  %v247_v31 = vld [vmem:[%s370_s5] ss:$0 sm:$0xff] }
   0x9   :  { %265 = vmatpush3.bf16.msra.mxu1 %v272_v8  ;;  %v248_v47 = vld [vmem:[#allocation2] ss:$0 sm:$0xff] }
  0xd9   :  { %v260_v10 = vpop.f32.mrb[0].mxu0 }
  0xda   :  { %v100_v11 = vadd.f32 %v260_v10, %v238_v9  ;;  %v91_v12 = vpop.f32.mrb[1].mxu0 }
  0xdb   :  { %v92_v13 = vadd.f32 %v238_v9, %v91_v12  ;;  %v261_v14 = vpop.f32.mrb[2].mxu0 }
  0xdc   :  { %v103_v15 = vadd.f32 %v261_v14, %v238_v9  ;;  %v94_v16 = vpop.f32.mrb[3].mxu0  ;;  %v108_v18 = vmax.f32 %v100_v11, 0.0 }
  0xdd   :  { %v95_v17 = vadd.f32 %v238_v9, %v94_v16  ;;  %v106_v20 = vmax.f32 %v92_v13, 0.0 }
  0xde   :  { %v109_v19 = vmax.f32 %v103_v15, 0.0 }
  0xdf   :  { %v107_v21 = vmax.f32 %v95_v17, 0.0 }
  0xe0   :  { %v111_v22 = vpack.c.bf16 %v109_v19, %v108_v18 }
  0xe1   :  { %v110_v23 = vpack.c.bf16 %v107_v21, %v106_v20 }
  0xe3   :  { %266 = vmatprep.mubr.msk.bf16.mxu1 %vm135_vm1, %v110_v23 }
  0xe4   :  { %267 = vmatmul.mubr.msk.bf16.vlgmr.msra.gmra.mrb[0].mxu1 %vm135_vm1, %v111_v22 }
 0x1b7   :  { %v268_v26 = vpop.f32.mrb[0].mxu1 }
 0x1b8   :  { %v185_v27 = vadd.f32 %v268_v26, %v242_v25  ;;  %v176_v28 = vpop.f32.mrb[1].mxu1 }
 0x1b9   :  { %v177_v29 = vadd.f32 %v242_v25, %v176_v28  ;;  %v269_v30 = vpop.f32.mrb[2].mxu1 }
 0x1ba   :  { %v193_v32 = vmax.f32 %v185_v27, 0.0  ;;  %v188_v33 = vadd.f32 %v269_v30, %v242_v25  ;;  %v179_v34 = vpop.f32.mrb[3].mxu1 }
 0x1bb   :  { %v191_v35 = vmax.f32 %v177_v29, 0.0  ;;  %v180_v36 = vadd.f32 %v242_v25, %v179_v34 }
 0x1bc   :  { %v194_v37 = vmax.f32 %v188_v33, 0.0  ;;  %v204_v38 = vmul.f32 %v247_v31, %v193_v32 }
 0x1bd   :  { %v192_v39 = vmax.f32 %v180_v36, 0.0  ;;  %v202_v40 = vmul.f32 %v247_v31, %v191_v35 }
 0x1be   :  { %v212_v41 = vsel %vm135_vm1, %v204_v38, 0.0  ;;  %v205_v42 = vmul.f32 %v247_v31, %v194_v37 }
 0x1bf   :  { %213 = vadd.xlane.f32.xlu1 %v212_v41  ;;  %v206_v43 = vsel %vm135_vm1, %v202_v40, 0.0  ;;  %v203_v44 = vmul.f32 %v247_v31, %v192_v39 }
 0x1c0   :  { %207 = vadd.xlane.f32.xlu0 %v206_v43  ;;  %v215_v45 = vsel %vm135_vm1, %v205_v42, 0.0 }
 0x1c1   :  { %v209_v46 = vsel %vm135_vm1, %v203_v44, 0.0 }
 0x1c3   :  { %216 = vadd.xlane.f32.xlu1 %v215_v45 }
 0x1c4   :  { %210 = vadd.xlane.f32.xlu0 %v209_v46 }
 0x24c   :  { %v214_v48 = vpop.xlane.xlu1 %213 }
 0x24d   :  { %v227_v49 = vadd.f32 %v248_v47, %v214_v48  ;;  %v208_v50 = vpop.xlane.xlu0 %207 }
 0x24e   :  { %v225_v51 = vadd.f32 %v248_v47, %v208_v50 }
 0x24f   :  { %232 = vst.msk [vmem:[%s371_s7 + $0x10] sm:$0xff] %vm229_vm2, %v227_v49 }
 0x250   :  { %230 = vst.msk [vmem:[%s371_s7] sm:$0xff] %vm229_vm2, %v225_v51  ;;  %v217_v52 = vpop.xlane.xlu1 %216 }
 0x251   :  { %v228_v53 = vadd.f32 %v248_v47, %v217_v52  ;;  %v211_v54 = vpop.xlane.xlu0 %210 }
 0x252   :  { %v226_v55 = vadd.f32 %v248_v47, %v211_v54 }
 0x253   :  { %233 = vst.msk [vmem:[%s371_s7 + $0x18] sm:$0xff] %vm229_vm2, %v228_v53 }
 0x254   :  { %231 = vst.msk [vmem:[%s371_s7 + $0x8] sm:$0xff] %vm229_vm2, %v226_v55 }

</bundles_post_ra>
